<compile_context>
chip_gen: v7x
topology: tpu7x:2x2x1
jax: 0.10.0
libtpu: 0.0.40
codegen_flags: <defaults>
</compile_context>

<pallas_src>
import jax
import jax.numpy as jnp
from jax.experimental import pallas as pl
from jax.experimental.pallas import tpu as pltpu

IN_FEATURES = 512
OUT_FEATURES = 6

# Scoped-VMEM limit we request: fits tb=4096 (incl. lane padding) on v5e/v6e/v7x.
VMEM_LIMIT_BYTES = 28 << 20
_LANE = 128


def _round_up(n, m):
    return ((n + m - 1) // m) * m


def _vmem_budget_bytes(tb):
    """Double-buffered VMEM footprint, counting lane padding to 128."""
    pad_out = _round_up(OUT_FEATURES, _LANE)           # 6 -> 128 lanes
    x_buf = tb * IN_FEATURES * 4
    o_buf = tb * pad_out * 4
    w_buf = IN_FEATURES * pad_out * 4
    b_buf = 8 * pad_out * 4                            # (1,6) padded to (8,128)
    return 2 * (x_buf + o_buf + w_buf + b_buf)


def ffm_kernel(x_ref, w_ref, b_ref, o_ref):
    # x_ref: (TILE_B, 512) VMEM tile, w_ref: (512, 6), b_ref: (1, 6)
    y = jnp.dot(x_ref[...], w_ref[...], preferred_element_type=jnp.float32)
    y = y + b_ref[...]                       # broadcast bias over batch rows
    o_ref[...] = jax.nn.sigmoid(y).astype(o_ref.dtype)


def feature_fusion_module(x, w, b, *, tile_b=4096):
    """x: (B, 512) f32, w: (512, 6) f32, b: (6,) f32 -> (B, 6) f32."""
    B = x.shape[0]

    # Batch tile: multiple of 8 (sublane granularity), no larger than needed.
    tb = min(tile_b, _round_up(max(B, 1), 8))
    # Guarantee >= 2 grid steps whenever B allows, so the "parallel" batch axis
    # actually lands on both TensorCores on v7x (neutral on v5e/v6e, 1 TC).
    if pl.cdiv(B, tb) == 1 and B > 8:
        tb = _round_up(pl.cdiv(B, 2), 8)

    # VMEM bookkeeping (with lane padding) must fit the scoped limit we request.
    assert _vmem_budget_bytes(tb) <= VMEM_LIMIT_BYTES, (
        f"tile_b={tb} needs {_vmem_budget_bytes(tb)} B VMEM > {VMEM_LIMIT_BYTES} B"
    )

    b2d = b.reshape(1, OUT_FEATURES)

    cost = pl.CostEstimate(
        flops=2 * B * IN_FEATURES * OUT_FEATURES,
        transcendentals=B * OUT_FEATURES,
        bytes_accessed=(B * IN_FEATURES * 4          # x read
                        + B * OUT_FEATURES * 4       # out write
                        + IN_FEATURES * OUT_FEATURES * 4
                        + OUT_FEATURES * 4),
    )

    return pl.pallas_call(
        ffm_kernel,
        out_shape=jax.ShapeDtypeStruct((B, OUT_FEATURES), x.dtype),
        grid_spec=pltpu.PrefetchScalarGridSpec(
            num_scalar_prefetch=0,
            grid=(pl.cdiv(B, tb),),
            in_specs=[
                # x: tiled over batch -> double-buffered HBM/compute overlap.
                pl.BlockSpec((tb, IN_FEATURES), lambda i: (i, 0)),
                # weight / bias: constant index_map -> stay resident in VMEM.
                pl.BlockSpec((IN_FEATURES, OUT_FEATURES), lambda i: (0, 0)),
                pl.BlockSpec((1, OUT_FEATURES), lambda i: (0, 0)),
            ],
            out_specs=pl.BlockSpec((tb, OUT_FEATURES), lambda i: (i, 0)),
        ),
        compiler_params=pltpu.CompilerParams(
            dimension_semantics=("parallel",),
            vmem_limit_bytes=VMEM_LIMIT_BYTES,
        ),
        cost_estimate=cost,
    )(x, w, b2d)


def init_params(key):
    # Mirror weights_init_kaiming for nn.Linear:
    #   kaiming_normal_(weight, a=0, mode='fan_out') -> std = sqrt(2 / fan_out)
    #   bias = 0
    # PyTorch weight is (out, in) = (6, 512); we store the transpose (512, 6).
    std = (2.0 / OUT_FEATURES) ** 0.5
    w_t = jax.random.normal(key, (OUT_FEATURES, IN_FEATURES), dtype=jnp.float32) * std
    w = jnp.transpose(w_t)                   # (512, 6)
    b = jnp.zeros((OUT_FEATURES,), dtype=jnp.float32)
    return w, b


if __name__ == "__main__":
    key = jax.random.PRNGKey(0)
    k_x, k_w, k_x2 = jax.random.split(key, 3)

    # Small primary test (single tile, B == 8 so no forced split).
    B = 8
    x = jax.random.normal(k_x, (B, IN_FEATURES), dtype=jnp.float32)
    w, b = init_params(k_w)

    out = feature_fusion_module(x, w, b)
    jax.block_until_ready(out)

    ref = jax.nn.sigmoid(x @ w + b)
    assert out.shape == (B, OUT_FEATURES)
    assert jnp.allclose(out, ref, atol=1e-5, rtol=1e-5)

    # Secondary test: B=520 with the default tile triggers the >=2-grid-step
    # split (two ~264-row tiles, ragged last block via masked writeback).
    B2 = 520
    x2 = jax.random.normal(k_x2, (B2, IN_FEATURES), dtype=jnp.float32)
    out2 = feature_fusion_module(x2, w, b)
    jax.block_until_ready(out2)
    ref2 = jax.nn.sigmoid(x2 @ w + b)
    assert out2.shape == (B2, OUT_FEATURES)
    assert jnp.allclose(out2, ref2, atol=1e-5, rtol=1e-5)

    # Tertiary test: explicit small tile -> many grid steps + ragged tail.
    out3 = feature_fusion_module(x2, w, b, tile_b=128)
    jax.block_until_ready(out3)
    assert jnp.allclose(out3, ref2, atol=1e-5, rtol=1e-5)

    print("KERNEL_OK")
</pallas_src>

<mosaic_0001>
module attributes {stable_mosaic.version = 11 : i64} {
  func.func @ffm_kernel(%arg0: i32, %arg1: memref<8x512xf32, #tpu.memory_space<vmem>>, %arg2: memref<512x6xf32, #tpu.memory_space<vmem>>, %arg3: memref<1x6xf32, #tpu.memory_space<vmem>>, %arg4: memref<8x6xf32, #tpu.memory_space<vmem>>) attributes {dimension_semantics = [#tpu.dimension_semantics<parallel>], iteration_bounds = array<i64: 1>, scalar_prefetch = 0 : i64, scratch_operands = 0 : i64, tpu.core_type = #tpu.core_type<tc>, window_params = [{transform_indices = @transform_0, window_bounds = array<i64: 8, 512>}, {pipeline_mode = #tpu.pipeline_mode<synchronous>, transform_indices = @transform_1, window_bounds = array<i64: 512, 6>}, {pipeline_mode = #tpu.pipeline_mode<synchronous>, transform_indices = @transform_2, window_bounds = array<i64: 1, 6>}, {transform_indices = @transform_3, window_bounds = array<i64: 8, 6>}]} {
    %c0 = arith.constant 0 : index
    %c0_0 = arith.constant 0 : index
    %0 = vector.load %arg1[%c0, %c0_0] : memref<8x512xf32, #tpu.memory_space<vmem>>, vector<8x512xf32>
    %c0_1 = arith.constant 0 : index
    %c0_2 = arith.constant 0 : index
    %1 = vector.load %arg2[%c0_1, %c0_2] : memref<512x6xf32, #tpu.memory_space<vmem>>, vector<512x6xf32>
    %cst = arith.constant dense<0.000000e+00> : vector<8x6xf32>
    %2 = tpu.matmul %0, %1, %cst {dimension_numbers = #tpu.dot_dimension_numbers<[1], [0], [0], [1], [0, 0, 1, 1], [], []>} : vector<8x512xf32>, vector<512x6xf32>, vector<8x6xf32> -> vector<8x6xf32>
    %c0_3 = arith.constant 0 : index
    %c0_4 = arith.constant 0 : index
    %3 = vector.load %arg3[%c0_3, %c0_4] : memref<1x6xf32, #tpu.memory_space<vmem>>, vector<1x6xf32>
    %4 = vector.broadcast %3 : vector<1x6xf32> to vector<8x6xf32>
    %5 = arith.addf %2, %4 : vector<8x6xf32>
    %6 = arith.negf %5 : vector<8x6xf32>
    %7 = math.exp %6 : vector<8x6xf32>
    %cst_5 = arith.constant 1.000000e+00 : f32
    %8 = vector.broadcast %cst_5 : f32 to vector<8x6xf32>
    %9 = arith.addf %8, %7 : vector<8x6xf32>
    %10 = arith.divf %8, %9 : vector<8x6xf32>
    %c0_6 = arith.constant 0 : index
    %c0_7 = arith.constant 0 : index
    %11 = vector.load %arg4[%c0_6, %c0_7] : memref<8x6xf32, #tpu.memory_space<vmem>>, vector<8x6xf32>
    tpu.vector_store %arg4[%c0_6, %c0_7], %10 {strides = array<i32>} : memref<8x6xf32, #tpu.memory_space<vmem>>, vector<8x6xf32>,
    return
  }
  func.func @transform_0(%arg0: i32) -> (i32, i32) {
    %c0_i32 = arith.constant 0 : i32
    %c0_i32_0 = arith.constant 0 : i32
    return %arg0, %c0_i32 : i32, i32
  }
  func.func @transform_1(%arg0: i32) -> (i32, i32) {
    %c0_i32 = arith.constant 0 : i32
    %c0_i32_0 = arith.constant 0 : i32
    %c0_i32_1 = arith.constant 0 : i32
    return %c0_i32, %c0_i32_0 : i32, i32
  }
  func.func @transform_2(%arg0: i32) -> (i32, i32) {
    %c0_i32 = arith.constant 0 : i32
    %c0_i32_0 = arith.constant 0 : i32
    %c0_i32_1 = arith.constant 0 : i32
    return %c0_i32, %c0_i32_0 : i32, i32
  }
  func.func @transform_3(%arg0: i32) -> (i32, i32) {
    %c0_i32 = arith.constant 0 : i32
    %c0_i32_0 = arith.constant 0 : i32
    return %arg0, %c0_i32 : i32, i32
  }
}

</mosaic_0001>

<bundles_post_ra>
// kernel: tpu_custom_call.1
= control target key start
LH: loop header
LB: loop body
LE: loop exit
PB: predicated region body
PF: predicated region fallthrough
CT: control target
= control target key end

     0   :  { %s657_s0 = inlined_call_operand.vmem [shape: f32[8,512], index: 0, kind: input, shape index: {}]   ;;  %s658_s1 = inlined_call_operand.vmem [shape: f32[512,6], index: 1, kind: input, shape index: {}]   ;;  %s659_s2 = inlined_call_operand.vmem [shape: f32[1,6], index: 2, kind: input, shape index: {}]   ;;  %s660_s3 = inlined_call_operand.hbm [shape: f32[8,6], index: 3, kind: output, shape index: {}]  }
   0x1   :  { %v35_v0 = vld [vmem:[%s658_s1 + $0x80] sm:$0xff]  ;;  %v36_v1 = vld [vmem:[%s658_s1 + $0x88] sm:$0xff]  ;;  %v37_v11 = vld [vmem:[%s658_s1 + $0x90] sm:$0xff] }
   0x2   :  { %v19_v2 = vld [vmem:[%s658_s1] sm:$0xff]  ;;  %v324_v3 = vpack.c.bf16 %v36_v1, %v35_v0  ;;  %v20_v4 = vld [vmem:[%s658_s1 + $0x8] sm:$0xff]  ;;  %v38_v13 = vld [vmem:[%s658_s1 + $0x98] sm:$0xff] }
   0x3   :  { %v67_v5 = vld [vmem:[%s658_s1 + $0x180] sm:$0xff]  ;;  %v68_v6 = vld [vmem:[%s658_s1 + $0x188] sm:$0xff]  ;;  %v326_v7 = vpack.c.bf16 %v20_v4, %v19_v2  ;;  %v21_v14 = vld [vmem:[%s658_s1 + $0x10] sm:$0xff]  ;;  %v328_v16 = vpack.c.bf16 %v38_v13, %v37_v11 }
   0x4   :  { %v356_v8 = vpack.c.bf16 %v68_v6, %v67_v5  ;;  %v51_v9 = vld [vmem:[%s658_s1 + $0x100] sm:$0xff]  ;;  %v52_v10 = vld [vmem:[%s658_s1 + $0x108] sm:$0xff]  ;;  %325 = vmatprep.subr.bf16.mxu0 %v324_v3  ;;  %v22_v15 = vld [vmem:[%s658_s1 + $0x18] sm:$0xff] }
   0x5   :  { %v358_v12 = vpack.c.bf16 %v52_v10, %v51_v9  ;;  %327 = vmatpush3.bf16.msra.mxu0 %v326_v7  ;;  %v330_v17 = vpack.c.bf16 %v22_v15, %v21_v14  ;;  %v69_v18 = vld [vmem:[%s658_s1 + $0x190] sm:$0xff]  ;;  %v70_v19 = vld [vmem:[%s658_s1 + $0x198] sm:$0xff]  ;;  %v39_v23 = vld [vmem:[%s658_s1 + $0xa0] sm:$0xff] }
   0x6   :  { %357 = vmatprep.subr.bf16.mxu1 %v356_v8  ;;  %v53_v20 = vld [vmem:[%s658_s1 + $0x110] sm:$0xff]  ;;  %v360_v21 = vpack.c.bf16 %v70_v19, %v69_v18  ;;  %v54_v22 = vld [vmem:[%s658_s1 + $0x118] sm:$0xff]  ;;  %v40_v24 = vld [vmem:[%s658_s1 + $0xa8] sm:$0xff]  ;;  %329 = vmatprep.subr.bf16.mxu0 %v328_v16 }
   0x7   :  { %359 = vmatpush3.bf16.msra.mxu1 %v358_v12  ;;  %v362_v25 = vpack.c.bf16 %v54_v22, %v53_v20  ;;  %v332_v26 = vpack.c.bf16 %v40_v24, %v39_v23  ;;  %v23_v27 = vld [vmem:[%s658_s1 + $0x20] sm:$0xff]  ;;  %v24_v28 = vld [vmem:[%s658_s1 + $0x28] sm:$0xff]  ;;  %v41_v35 = vld [vmem:[%s658_s1 + $0xb0] sm:$0xff] }
   0x8   :  { %v71_v29 = vld [vmem:[%s658_s1 + $0x1a0] sm:$0xff]  ;;  %361 = vmatprep.subr.bf16.mxu1 %v360_v21  ;;  %v72_v30 = vld [vmem:[%s658_s1 + $0x1a8] sm:$0xff]  ;;  %v334_v33 = vpack.c.bf16 %v24_v28, %v23_v27  ;;  %v42_v36 = vld [vmem:[%s658_s1 + $0xb8] sm:$0xff] }
   0x9   :  { %v55_v31 = vld [vmem:[%s658_s1 + $0x120] sm:$0xff]  ;;  %v56_v32 = vld [vmem:[%s658_s1 + $0x128] sm:$0xff]  ;;  %331 = vmatpush3.bf16.msra.mxu0 %v330_v17  ;;  %v364_v34 = vpack.c.bf16 %v72_v30, %v71_v29  ;;  %v25_v37 = vld [vmem:[%s658_s1 + $0x30] sm:$0xff]  ;;  %v336_v39 = vpack.c.bf16 %v42_v36, %v41_v35 }
   0xa   :  { %333 = vmatprep.subr.bf16.mxu0 %v332_v26  ;;  %v366_v38 = vpack.c.bf16 %v56_v32, %v55_v31  ;;  %v26_v40 = vld [vmem:[%s658_s1 + $0x38] sm:$0xff]  ;;  %v73_v41 = vld [vmem:[%s658_s1 + $0x1b0] sm:$0xff]  ;;  %v43_v46 = vld [vmem:[%s658_s1 + $0xc0] sm:$0xff] }
   0xb   :  { %363 = vmatpush3.bf16.msra.mxu1 %v362_v25  ;;  %v74_v42 = vld [vmem:[%s658_s1 + $0x1b8] sm:$0xff]  ;;  %v57_v44 = vld [vmem:[%s658_s1 + $0x130] sm:$0xff]  ;;  %v44_v47 = vld [vmem:[%s658_s1 + $0xc8] sm:$0xff]  ;;  %v338_v48 = vpack.c.bf16 %v26_v40, %v25_v37 }
   0xc   :  { %365 = vmatprep.subr.bf16.mxu1 %v364_v34  ;;  %v368_v43 = vpack.c.bf16 %v74_v42, %v73_v41  ;;  %v58_v45 = vld [vmem:[%s658_s1 + $0x138] sm:$0xff]  ;;  %v75_v49 = vld [vmem:[%s658_s1 + $0x1c0] sm:$0xff]  ;;  %v76_v50 = vld [vmem:[%s658_s1 + $0x1c8] sm:$0xff]  ;;  %v340_v52 = vpack.c.bf16 %v44_v47, %v43_v46 }
   0xd   :  { %335 = vmatpush3.bf16.msra.mxu0 %v334_v33  ;;  %v370_v51 = vpack.c.bf16 %v58_v45, %v57_v44  ;;  %v27_v53 = vld [vmem:[%s658_s1 + $0x40] sm:$0xff]  ;;  %v28_v54 = vld [vmem:[%s658_s1 + $0x48] sm:$0xff]  ;;  %v372_v56 = vpack.c.bf16 %v76_v50, %v75_v49  ;;  %v45_v58 = vld [vmem:[%s658_s1 + $0xd0] sm:$0xff] }
   0xe   :  { %337 = vmatprep.subr.bf16.mxu0 %v336_v39  ;;  %v59_v55 = vld [vmem:[%s658_s1 + $0x140] sm:$0xff]  ;;  %v60_v57 = vld [vmem:[%s658_s1 + $0x148] sm:$0xff]  ;;  %v46_v59 = vld [vmem:[%s658_s1 + $0xd8] sm:$0xff]  ;;  %v342_v62 = vpack.c.bf16 %v28_v54, %v27_v53 }
   0xf   :  { %367 = vmatpush3.bf16.msra.mxu1 %v366_v38  ;;  %v77_v60 = vld [vmem:[%s658_s1 + $0x1d0] sm:$0xff]  ;;  %v78_v61 = vld [vmem:[%s658_s1 + $0x1d8] sm:$0xff]  ;;  %v374_v63 = vpack.c.bf16 %v60_v57, %v59_v55  ;;  %v344_v0 = vpack.c.bf16 %v46_v59, %v45_v58  ;;  %v47_v6 = vld [vmem:[%s658_s1 + $0xe0] sm:$0xff] }
  0x10   :  { %369 = vmatprep.subr.bf16.mxu1 %v368_v43  ;;  %v29_v1 = vld [vmem:[%s658_s1 + $0x50] sm:$0xff]  ;;  %v30_v2 = vld [vmem:[%s658_s1 + $0x58] sm:$0xff]  ;;  %v376_v4 = vpack.c.bf16 %v78_v61, %v77_v60  ;;  %v48_v7 = vld [vmem:[%s658_s1 + $0xe8] sm:$0xff] }
  0x11   :  { %339 = vmatpush3.bf16.msra.mxu0 %v338_v48  ;;  %v61_v3 = vld [vmem:[%s658_s1 + $0x150] sm:$0xff]  ;;  %v62_v5 = vld [vmem:[%s658_s1 + $0x158] sm:$0xff]  ;;  %v79_v8 = vld [vmem:[%s658_s1 + $0x1e0] sm:$0xff]  ;;  %v346_v10 = vpack.c.bf16 %v30_v2, %v29_v1  ;;  %v348_v15 = vpack.c.bf16 %v48_v7, %v47_v6 }
  0x12   :  { %341 = vmatprep.subr.bf16.mxu0 %v340_v52  ;;  %v80_v9 = vld [vmem:[%s658_s1 + $0x1e8] sm:$0xff]  ;;  %v31_v11 = vld [vmem:[%s658_s1 + $0x60] sm:$0xff]  ;;  %v378_v14 = vpack.c.bf16 %v62_v5, %v61_v3  ;;  %v49_v17 = vld [vmem:[%s658_s1 + $0xf0] sm:$0xff] }
  0x13   :  { %371 = vmatpush3.bf16.msra.mxu1 %v370_v51  ;;  %v32_v12 = vld [vmem:[%s658_s1 + $0x68] sm:$0xff]  ;;  %v63_v13 = vld [vmem:[%s658_s1 + $0x160] sm:$0xff]  ;;  %v380_v19 = vpack.c.bf16 %v80_v9, %v79_v8  ;;  %v50_v20 = vld [vmem:[%s658_s1 + $0xf8] sm:$0xff] }
  0x14   :  { %373 = vmatprep.subr.bf16.mxu1 %v372_v56  ;;  %v64_v16 = vld [vmem:[%s658_s1 + $0x168] sm:$0xff]  ;;  %v18_v21 = vld [vmem:[%s657_s0 + $0x18] sm:$0xff] }
  0x15   :  { %343 = vmatpush3.bf16.msra.mxu0 %v342_v62  ;;  %v16_v18 = vld [vmem:[%s657_s0 + $0x8] sm:$0xff] }
  0x16   :  { %345 = vmatprep.subr.bf16.mxu0 %v344_v0  ;;  %154 = vmatprep.mubr.f32.mxu0 %v16_v18 }
  0x17   :  { %375 = vmatpush3.bf16.msra.mxu1 %v374_v63 }
  0x18   :  { %377 = vmatprep.subr.bf16.mxu1 %v376_v4 }
  0x19   :  { %8 = vsyncpa [#allocation3], 0  ;;  %v81_v22 = vld [vmem:[%s658_s1 + $0x1f0] sm:$0xff]  ;;  %v82_v23 = vld [vmem:[%s658_s1 + $0x1f8] sm:$0xff]  ;;  %224 = vmatprep.mubr.f32.mxu1 %v18_v21  ;;  %347 = vmatpush3.bf16.msra.mxu0 %v346_v10  ;;  %v350_v24 = vpack.c.bf16 %v32_v12, %v31_v11  ;;  %v382_v25 = vpack.c.bf16 %v64_v16, %v63_v13  ;;  %v352_v26 = vpack.c.bf16 %v50_v20, %v49_v17  ;;  %vm236_vm0 = vcmask 48128  }
  0x1a   :  { %349 = vmatprep.subr.bf16.mxu0 %v348_v15  ;;  %v33_v27 = vld [vmem:[%s658_s1 + $0x70] sm:$0xff]  ;;  %v34_v28 = vld [vmem:[%s658_s1 + $0x78] sm:$0xff]  ;;  %v384_v29 = vpack.c.bf16 %v82_v23, %v81_v22  ;;  %v15_v34 = vld [vmem:[%s657_s0] sm:$0xff] }
  0x1b   :  { %379 = vmatpush3.bf16.msra.mxu1 %v378_v14  ;;  %v65_v30 = vld [vmem:[%s658_s1 + $0x170] sm:$0xff]  ;;  %v66_v31 = vld [vmem:[%s658_s1 + $0x178] sm:$0xff]  ;;  %v354_v32 = vpack.c.bf16 %v34_v28, %v33_v27  ;;  %v252_v37 = vld [vmem:[%s659_s2] ss:$0 sm:$0xff] }
  0x1c   :  { %381 = vmatprep.subr.bf16.mxu1 %v380_v19  ;;  %v386_v33 = vpack.c.bf16 %v66_v31, %v65_v30  ;;  %v17_v35 = vld [vmem:[%s657_s0 + $0x10] sm:$0xff]  ;;  %s417_s0 = smov [#allocation2]  }
  0x1d   :  { %351 = vmatpush3.bf16.msra.mxu0 %v350_v24  ;;  %s244_s14 = sshll.u32 %s417_s0, 4  ;;  %s245_s14 = int_to_ptr.vmem [resolvable:$true] %s244_s14 }
  0x1e   :  { %353 = vmatprep.subr.bf16.mxu0 %v352_v26  ;;  %s393_s15 = scalar_lea.vmem %s245_s14, 128  ;;  %p398_p1 = scmp.lt.s32.totalorder %s245_s14, %s245_s14 }
  0x1f   :  { %383 = vmatpush3.bf16.msra.mxu1 %v382_v25  ;;  %p394_p0 = scmp.ne.s32.totalorder %s245_s14, %s393_s15  ;;  %p399_p2 = scmp.lt.s32.totalorder %s393_s15, %s393_s15 }
  0x20   :  { %385 = vmatprep.subr.bf16.mxu1 %v384_v29 }
  0x21   :  { %355 = vmatpush3.bf16.msra.mxu0 %v354_v32  ;;  %p400_p3 = por %p399_p2, %p398_p1 }
  0x23   :  { %387 = vmatpush3.bf16.msra.mxu1 %v386_v33  ;;  %p401_p4 = pnand %p400_p3, %p394_p0 }
  0x24   :  { %155 = vmatmul.mubr.f32.vlgmr.msra.gmra.mrb[0].mxu0 %v15_v34 }
  0x26   :  { %225 = vmatmul.mubr.f32.vlgmr.msra.gmra.mrb[0].mxu1 %v17_v35 }
  0xf7   :  { %v286_v36 = vpop.f32.mrb[0].mxu0 }
  0xf8   :  { %v287_v38 = vpop.f32.mrb[1].mxu0 }
  0xf9   :  { %v321_v39 = vpop.f32.mrb[0].mxu1  ;;  %v288_v40 = vadd.f32 %v287_v38, %v286_v36 }
  0xfa   :  { %v322_v41 = vpop.f32.mrb[1].mxu1 }
  0xfb   :  { %v323_v42 = vadd.f32 %v322_v41, %v321_v39  ;;  %v157_v43 = vadd.f32 %v288_v40, %v252_v37 }
  0xfd   :  { %v227_v44 = vadd.f32 %v323_v42, %v157_v43 }
  0xff   :  { %v253_v45 = vmul.f32 -1.442695, %v227_v44 }
 0x101   :  { %389 = vpow2.f32 %v253_v45 }
 0x10b   :  { %v390_v46 = vpop.eup %389 }
 0x10c   :  { %v233_v47 = vadd.f32 1.0, %v390_v46 }
 0x10e   :  { %391 = vrcp.f32 %v233_v47 }
 0x118   :  { %v392_v48 = vpop.eup %391 }
 0x119   :  { %237 = vst.msk [vmem:[#allocation2] sm:$0xff] %vm236_vm0, %v392_v48 }
 0x11a   :  { %404 = shalt.err (!%p401_p4)
}
 0x11b   :  { %s405_s17 = scalar_lea.hbm %s660_s3, 128 }
 0x11c   :  { %p406_p5 = scmp.ne.s32.totalorder %s660_s3, %s405_s17  ;;  %p409_p6 = scmp.lt.u32.totalorder %s405_s17, %s660_s3 }
 0x11e   :  { %p411_p7 = pnand %p409_p6, %p406_p5 }
 0x120   :  { %414 = shalt.err (!%p411_p7)
}
 0x121   :  { %247 = dma.vmem_to_hbm [thread:$0]  %s245_s14, 128, %s660_s3, [#allocation3]  }
 0x122   :  { %415 = dma.done.wait [#allocation3], 128  }
 0x123   :  { %416 = vsyncadd [#allocation3], 4294967168 }
 0x124   :  { %251 = vsyncpa [#allocation3], 1 }

</bundles_post_ra>
